<compile_context>
chip_gen: v5e
topology: v5e:2x2
jax: 0.10.0
libtpu: 0.0.40
codegen_flags: <defaults>
</compile_context>

<pallas_src>
import jax
import jax.numpy as jnp
from jax.experimental import pallas as pl
from jax.experimental.pallas import tpu as pltpu


def _round_up(x: int, m: int) -> int:
    return ((x + m - 1) // m) * m


# ----------------------------- Pallas kernel -------------------------------
def _conv_kernel(w_ref, p_ref, o_ref):
    # w_ref: (COUT_P, K_P)     bf16  conv weights, bias folded into column K
    # p_ref: (K_P, TILE_M)     bf16  im2col patches (row K is all-ones)
    # o_ref: (COUT_P, TILE_M)  f32   lane-dense output tile
    o_ref[...] = jnp.dot(w_ref[...], p_ref[...],
                         preferred_element_type=jnp.float32)


# --------------------------- Wrapper (glue) ---------------------------------
@jax.jit
def mobilenet_forward(x_nchw, weight, bias):
    """Equivalent of MobileNet.forward: Conv2d(3, 10, k=3, s=2, p=1).

    x_nchw: (N, 3, H, W) float32
    weight: (10, 3, 3, 3) float32  (PyTorch OIHW layout)
    bias:   (10,) float32
    returns (N, 10, OH, OW) float32
    """
    cout, cin, kh, kw = weight.shape
    stride, pad = 2, 1
    n, _, h, w = x_nchw.shape
    oh = (h + 2 * pad - kh) // stride + 1
    ow = (w + 2 * pad - kw) // stride + 1
    m = n * oh * ow                      # batch folded into the lane axis
    k = cin * kh * kw

    # im2col in bf16 (cast BEFORE the 9x tap expansion).  K index order is
    # (ci, ky, kx) to match weight.reshape(cout, k); M index order is (b, y, x).
    x_bf = x_nchw.astype(jnp.bfloat16)
    x_pad = jnp.pad(x_bf, ((0, 0), (0, 0), (pad, pad), (pad, pad)))
    taps = []
    for ky in range(kh):
        for kx in range(kw):
            taps.append(x_pad[:, :,
                              ky:ky + stride * oh:stride,
                              kx:kx + stride * ow:stride])
    patches = jnp.stack(taps, axis=2)                       # (N, Cin, KH*KW, OH, OW)
    patches = patches.transpose(1, 2, 0, 3, 4).reshape(k, m)  # (K, M)

    # Padded sizes; bias occupies row/column index `k` of the K-padding slack.
    cout_p = _round_up(cout, 8)
    k_p = _round_up(k + 1, 8)

    # Lane-axis tiling: trade per-grid-step overhead (~0.35 us ~= ~0.5 MB of
    # HBM bandwidth) against zero-padding waste; pad M up to a tile multiple.
    step_overhead_bytes = 512 * 1024
    bytes_per_lane = k_p * 2 + cout_p * 4       # bf16 patch read + f32 writeback
    tile_m, best_cost = 128, None
    for cand in (8192, 4096, 2048, 1024, 512, 256, 128):
        m_pad_c = _round_up(m, cand)
        cost = (m_pad_c // cand) * step_overhead_bytes + m_pad_c * bytes_per_lane
        if best_cost is None or cost < best_cost:
            best_cost, tile_m = cost, cand
    m_pad = _round_up(m, tile_m)
    n_tiles = m_pad // tile_m

    # Patches: real K rows, then an all-ones row (bias tap), then zero rows.
    ones_row = jnp.ones((1, m), jnp.bfloat16)
    zero_rows = jnp.zeros((k_p - k - 1, m), jnp.bfloat16)
    patches_p = jnp.concatenate([patches, ones_row, zero_rows], axis=0)
    patches_p = jnp.pad(patches_p, ((0, 0), (0, m_pad - m)))

    # Weights: flatten, append the bias column, cast bf16, pad to (COUT_P, K_P).
    w_aug = jnp.concatenate(
        [weight.reshape(cout, k), bias.reshape(cout, 1)], axis=1)
    w_p = jnp.pad(w_aug.astype(jnp.bfloat16),
                  ((0, cout_p - cout), (0, k_p - k - 1)))

    out_p = pl.pallas_call(
        _conv_kernel,
        out_shape=jax.ShapeDtypeStruct((cout_p, m_pad), jnp.float32),
        grid=(n_tiles,),
        in_specs=[
            pl.BlockSpec((cout_p, k_p), lambda j: (0, 0)),   # weight: resident
            pl.BlockSpec((k_p, tile_m), lambda j: (0, j)),   # patches: streamed
        ],
        out_specs=pl.BlockSpec((cout_p, tile_m), lambda j: (0, j)),
        compiler_params=pltpu.CompilerParams(
            dimension_semantics=("parallel",)),
    )(w_p, patches_p)

    # (COUT_P, M_pad) -> (N, COUT, OH, OW): slice, reshape, small NC transpose.
    out = out_p[:cout, :m].reshape(cout, n, oh, ow)
    return jnp.transpose(out, (1, 0, 2, 3))


# ------------------------------- main ---------------------------------------
if __name__ == "__main__":
    key = jax.random.PRNGKey(0)
    kx, kw_, kb = jax.random.split(key, 3)

    # Deterministic synthetic parameters (Conv2d(3, 10, 3) shapes).
    fan_in = 3 * 3 * 3
    bound = 1.0 / (fan_in ** 0.5)
    weight = jax.random.uniform(kw_, (10, 3, 3, 3), jnp.float32, -bound, bound)
    bias = jax.random.uniform(kb, (10,), jnp.float32, -bound, bound)

    # Small NCHW input consistent with the module: (N=2, C=3, H=16, W=16).
    x = jax.random.normal(kx, (2, 3, 16, 16), jnp.float32)

    out = mobilenet_forward(x, weight, bias)
    out = jax.block_until_ready(out)
    assert out.shape == (2, 10, 8, 8), out.shape

    # Cross-check against XLA's native convolution with the same bf16 input /
    # weight quantization and f32 accumulation.
    ref = jax.lax.conv_general_dilated(
        x.astype(jnp.bfloat16), weight.astype(jnp.bfloat16),
        window_strides=(2, 2), padding=((1, 1), (1, 1)),
        dimension_numbers=("NCHW", "OIHW", "NCHW"),
        preferred_element_type=jnp.float32,
    ) + bias[None, :, None, None]
    assert jnp.max(jnp.abs(out - ref)) < 1e-2, float(jnp.max(jnp.abs(out - ref)))

    # Looser sanity check against the full-f32 reference as well.
    ref32 = jax.lax.conv_general_dilated(
        x, weight, window_strides=(2, 2), padding=((1, 1), (1, 1)),
        dimension_numbers=("NCHW", "OIHW", "NCHW"),
    ) + bias[None, :, None, None]
    assert jnp.max(jnp.abs(out - ref32)) < 5e-2, float(jnp.max(jnp.abs(out - ref32)))

    print("KERNEL_OK")
</pallas_src>

<mosaic_0001>
module attributes {stable_mosaic.version = 11 : i64} {
  func.func @_conv_kernel(%arg0: i32, %arg1: memref<16x32xbf16, #tpu.memory_space<vmem>>, %arg2: memref<32x128xbf16, #tpu.memory_space<vmem>>, %arg3: memref<16x128xf32, #tpu.memory_space<vmem>>) attributes {dimension_semantics = [#tpu.dimension_semantics<parallel>], iteration_bounds = array<i64: 1>, scalar_prefetch = 0 : i64, scratch_operands = 0 : i64, tpu.core_type = #tpu.core_type<tc>, window_params = [{pipeline_mode = #tpu.pipeline_mode<synchronous>, transform_indices = @transform_0, window_bounds = array<i64: 16, 32>}, {transform_indices = @transform_1, window_bounds = array<i64: 32, 128>}, {transform_indices = @transform_2, window_bounds = array<i64: 16, 128>}]} {
    %c0 = arith.constant 0 : index
    %c0_0 = arith.constant 0 : index
    %0 = vector.load %arg1[%c0, %c0_0] : memref<16x32xbf16, #tpu.memory_space<vmem>>, vector<16x32xbf16>
    %c0_1 = arith.constant 0 : index
    %c0_2 = arith.constant 0 : index
    %1 = vector.load %arg2[%c0_1, %c0_2] : memref<32x128xbf16, #tpu.memory_space<vmem>>, vector<32x128xbf16>
    %cst = arith.constant dense<0.000000e+00> : vector<16x128xf32>
    %2 = tpu.matmul %0, %1, %cst {dimension_numbers = #tpu.dot_dimension_numbers<[1], [0], [0], [1], [0, 0, 1, 1], [], []>} : vector<16x32xbf16>, vector<32x128xbf16>, vector<16x128xf32> -> vector<16x128xf32>
    %c0_3 = arith.constant 0 : index
    %c0_4 = arith.constant 0 : index
    %3 = vector.load %arg3[%c0_3, %c0_4] : memref<16x128xf32, #tpu.memory_space<vmem>>, vector<16x128xf32>
    tpu.vector_store %arg3[%c0_3, %c0_4], %2 {strides = array<i32>} : memref<16x128xf32, #tpu.memory_space<vmem>>, vector<16x128xf32>,
    return
  }
  func.func @transform_0(%arg0: i32) -> (i32, i32) {
    %c0_i32 = arith.constant 0 : i32
    %c0_i32_0 = arith.constant 0 : i32
    %c0_i32_1 = arith.constant 0 : i32
    return %c0_i32, %c0_i32_0 : i32, i32
  }
  func.func @transform_1(%arg0: i32) -> (i32, i32) {
    %c0_i32 = arith.constant 0 : i32
    %c0_i32_0 = arith.constant 0 : i32
    return %c0_i32, %arg0 : i32, i32
  }
  func.func @transform_2(%arg0: i32) -> (i32, i32) {
    %c0_i32 = arith.constant 0 : i32
    %c0_i32_0 = arith.constant 0 : i32
    return %c0_i32, %arg0 : i32, i32
  }
}

</mosaic_0001>

<bundles_post_ra>
// kernel: mobilenet_forward.1
= control target key start
LH: loop header
LB: loop body
LE: loop exit
PB: predicated region body
PF: predicated region fallthrough
CT: control target
= control target key end

     0   :  { %vm35_vm0 = vcmask 261120   ;;  %s105_s1 = inlined_call_operand.vmem [shape: bf16[32,128], index: 1, kind: input, shape index: {}]   ;;  %s106_s0 = inlined_call_operand.vmem [shape: bf16[16,32], index: 0, kind: input, shape index: {}]   ;;  %s107_s2 = inlined_call_operand.vmem [shape: f32[16,128], index: 2, kind: output, shape index: {}]  }
   0x1   :  { %v74_v0 = vld [vmem:[%s105_s1 + $0x8] sm:$0xff]  ;;  %v73_v1 = vld [vmem:[%s105_s1] sm:$0xff] }
   0x2   :  { %45 = vmatpush.bf16.msra.mxu0 %v74_v0  ;;  %v72_v2 = vld [vmem:[%s106_s0] sm:$0xff] }
   0x6   :  { %46 = vmatpush.bf16.msra.mxu0 %v73_v1 }
   0x9   :  { %71 = vmatmul.msk.bf16.vlgmr.msra.gmra.mxu0 %vm35_vm0, %v72_v2 }
  0x86   :  { %v48_v3 = vpop.f32.mrf.mxu0 }
  0x87   :  { %53 = vst [vmem:[%s107_s2] sm:$0xff] %v48_v3 }
  0x8e   :  { %v50_v4 = vpop.f32.mrf.mxu0 }
  0x8f   :  { %54 = vst [vmem:[%s107_s2 + $0x8] sm:$0xff] %v50_v4 }

</bundles_post_ra>
